<compile_context>
chip_gen: v5e
topology: v5e:2x2
jax: 0.10.0
libtpu: 0.0.40
codegen_flags: <defaults>
</compile_context>

<pallas_src>
import functools

import jax
import jax.numpy as jnp
from jax.experimental import pallas as pl
from jax.experimental.pallas import tpu as pltpu


def _round_up(x, m):
    return ((x + m - 1) // m) * m


def _mean_iou_kernel(pred_ref, true_ref, out_ref, acc_ref, *,
                     n_classes, hw, tile_cols, mask_tail, cast_f32):
    j = pl.program_id(1)
    last_j = pl.num_programs(1) - 1

    @pl.when(j == 0)
    def _init():
        acc_ref[...] = jnp.zeros_like(acc_ref)

    # Refs are (C, tile_cols): classes on sublanes, pixels on lanes.
    p = pred_ref[...]
    t = true_ref[...]
    if cast_f32:
        # Keep a float32 compare path for sub-f32 inputs (v5e VPU has no bf16).
        # TODO(synk): compare in native bf16 on v6e/v7x (needs chip detection).
        p = p.astype(jnp.float32)
        t = t.astype(jnp.float32)

    # (C, 1) iota; jnp.where broadcasts it across lanes (no (C, tc) iota/step).
    class_iota = jax.lax.broadcasted_iota(jnp.int32, (n_classes, 1), 0)

    def argmax_first(x):
        # argmax over the class (sublane) axis with first-index tie-breaking
        # (matches torch.argmax / jnp.argmax).
        mx = jnp.max(x, axis=0, keepdims=True)                      # (1, tc)
        return jnp.min(jnp.where(x == mx, class_iota, n_classes),
                       axis=0, keepdims=True)                       # (1, tc)

    match = (argmax_first(p) == argmax_first(t)).astype(jnp.int32)  # (1, tc)

    if mask_tail:
        # The last column tile reads past HW (unspecified bytes) -> mask it.
        @pl.when(j == last_j)
        def _acc_tail():
            lane = jax.lax.broadcasted_iota(jnp.int32, match.shape, 1)
            acc_ref[...] += jnp.where(j * tile_cols + lane < hw, match, 0)

        @pl.when(j != last_j)
        def _acc_body():
            acc_ref[...] += match
    else:
        acc_ref[...] += match

    @pl.when(j == last_j)
    def _finalize():
        tp = jnp.sum(acc_ref[...])                # exact int32 count for this n
        out_ref[...] = jnp.broadcast_to(tp, out_ref.shape)


def mean_iou(y_pred, y_true, n_classes=13, smooth=1e-5, tile_cols=32768):
    """y_pred, y_true: float arrays of shape [N, n_classes, H, W] (NCHW)."""
    assert y_pred.shape == y_true.shape, (y_pred.shape, y_true.shape)
    N, C, H, W = y_pred.shape
    assert C == n_classes
    HW = H * W

    # Free metadata reshape (contiguous): [N, C, H, W] -> [N, C, H*W].
    pred3d = y_pred.reshape(N, C, HW)
    true3d = y_true.reshape(N, C, HW)

    # Lane-axis tile size: multiple of 128, capped by the (rounded-up) pixel
    # count so tiny inputs don't over-allocate.
    tc = min(int(tile_cols), _round_up(HW, 128))
    tc = _round_up(tc, 128)
    num_j = pl.cdiv(HW, tc)
    mask_tail = (HW % tc) != 0
    cast_f32 = (jnp.dtype(y_pred.dtype) != jnp.float32 or
                jnp.dtype(y_true.dtype) != jnp.float32)

    kernel = functools.partial(
        _mean_iou_kernel,
        n_classes=C,
        hw=HW,
        tile_cols=tc,
        mask_tail=mask_tail,
        cast_f32=cast_f32,
    )

    # VMEM budget: 2 inputs x 2 pipeline buffers (C padded to 16 sublanes at
    # f32) + the int32 accumulator scratch; cap within v7x's 64 MiB VMEM.
    in_blk_bytes = _round_up(C, 8) * tc * 4
    vmem_est = 4 * in_blk_bytes + 8 * tc * 4 + (2 << 20)
    vmem_limit = int(min(max(2 * vmem_est, 32 << 20), 64 << 20))

    in_bytes = N * C * HW * (jnp.dtype(y_pred.dtype).itemsize
                             + jnp.dtype(y_true.dtype).itemsize)
    cost = pl.CostEstimate(flops=8 * N * C * HW, transcendentals=0,
                           bytes_accessed=in_bytes + N * 128 * 4)

    tp_counts = pl.pallas_call(
        kernel,
        out_shape=jax.ShapeDtypeStruct((N, 1, 128), jnp.int32),
        grid_spec=pltpu.PrefetchScalarGridSpec(
            num_scalar_prefetch=0,
            grid=(N, num_j),
            in_specs=[
                pl.BlockSpec((None, C, tc), lambda n, j: (n, 0, j)),
                pl.BlockSpec((None, C, tc), lambda n, j: (n, 0, j)),
            ],
            out_specs=pl.BlockSpec((1, 1, 128), lambda n, j: (n, 0, 0)),
            scratch_shapes=[pltpu.VMEM((1, tc), jnp.int32)],
        ),
        compiler_params=pltpu.CompilerParams(
            # Batch axis "parallel": on v7x the 2 TensorCores split the batch
            # (each writes its own per-n partial TP); neutral on v5e/v6e.
            dimension_semantics=("parallel", "arbitrary"),
            vmem_limit_bytes=vmem_limit,
        ),
        cost_estimate=cost,
    )(pred3d, true3d)

    tp = jnp.sum(tp_counts[:, 0, 0]).astype(jnp.float32)
    n_valid = jnp.float32(N * HW)
    # T, P one-hot per pixel => FN = FP = n_valid - TP.
    return (tp + smooth) / (2.0 * n_valid - tp + smooth)


def _reference_mean_iou(y_pred, y_true, n_classes=13, smooth=1e-5):
    """Pure-JAX reference mirroring the PyTorch module."""
    t = jnp.transpose(y_true, (0, 2, 3, 1))
    p = jnp.transpose(y_pred, (0, 2, 3, 1))
    T = jax.nn.one_hot(jnp.argmax(t, axis=3), n_classes).reshape(-1)
    P = jax.nn.one_hot(jnp.argmax(p, axis=3), n_classes).reshape(-1)
    TP = jnp.sum(T * P)
    FN = jnp.sum(T * (1 - P))
    FP = jnp.sum((1 - T) * P)
    return (TP + smooth) / (TP + FN + FP + smooth)


if __name__ == "__main__":
    n_classes = 13
    N, H, W = 2, 16, 16  # 256 pixels -> one 256-wide column tile per batch elem

    key = jax.random.PRNGKey(0)
    k1, k2 = jax.random.split(key)
    y_pred = jax.random.normal(k1, (N, n_classes, H, W), dtype=jnp.float32)
    y_true = jax.random.normal(k2, (N, n_classes, H, W), dtype=jnp.float32)

    iou = jax.block_until_ready(mean_iou(y_pred, y_true, n_classes=n_classes))
    ref = jax.block_until_ready(_reference_mean_iou(y_pred, y_true, n_classes))
    assert jnp.allclose(iou, ref, rtol=1e-5, atol=1e-6), (iou, ref)

    # Also exercise the ragged / masked-tail path (H*W not a multiple of 128),
    # which now relies on the in-kernel lane mask instead of jnp.pad.
    H2, W2 = 10, 10
    y_pred2 = jax.random.normal(k1, (N, n_classes, H2, W2), dtype=jnp.float32)
    y_true2 = jax.random.normal(k2, (N, n_classes, H2, W2), dtype=jnp.float32)
    iou2 = jax.block_until_ready(mean_iou(y_pred2, y_true2, n_classes=n_classes))
    ref2 = jax.block_until_ready(_reference_mean_iou(y_pred2, y_true2, n_classes))
    assert jnp.allclose(iou2, ref2, rtol=1e-5, atol=1e-6), (iou2, ref2)

    print("KERNEL_OK")
</pallas_src>

<mosaic_0001>
module attributes {stable_mosaic.version = 11 : i64} {
  func.func @_mean_iou_kernel(%arg0: i32, %arg1: i32, %arg2: memref<1x13x256xf32, #tpu.memory_space<vmem>>, %arg3: memref<1x13x256xf32, #tpu.memory_space<vmem>>, %arg4: memref<1x1x128xi32, #tpu.memory_space<vmem>>, %arg5: memref<1x256xi32, #tpu.memory_space<vmem>>) attributes {dimension_semantics = [#tpu.dimension_semantics<parallel>, #tpu.dimension_semantics<arbitrary>], iteration_bounds = array<i64: 2, 1>, scalar_prefetch = 0 : i64, scratch_operands = 1 : i64, tpu.core_type = #tpu.core_type<tc>, window_params = [{transform_indices = @transform_0, window_bounds = array<i64: 1, 13, 256>}, {transform_indices = @transform_1, window_bounds = array<i64: 1, 13, 256>}, {transform_indices = @transform_2, window_bounds = array<i64: 1, 1, 128>}]} {
    %c0_i32 = arith.constant 0 : i32
    %0 = arith.cmpi eq, %arg1, %c0_i32 : i32
    %1 = arith.extui %0 : i1 to i32
    %c0_i32_0 = arith.constant 0 : i32
    %2 = arith.cmpi ne, %1, %c0_i32_0 : i32
    scf.if %2 {
      %c0_i32_16 = arith.constant 0 : i32
      %36 = vector.broadcast %c0_i32_16 : i32 to vector<1x256xi32>
      %c0_17 = arith.constant 0 : index
      %c0_18 = arith.constant 0 : index
      %37 = vector.load %arg5[%c0_17, %c0_18] : memref<1x256xi32, #tpu.memory_space<vmem>>, vector<1x256xi32>
      tpu.vector_store %arg5[%c0_17, %c0_18], %36 {strides = array<i32>} : memref<1x256xi32, #tpu.memory_space<vmem>>, vector<1x256xi32>,
    } else {
    }
    %c0 = arith.constant 0 : index
    %c0_1 = arith.constant 0 : index
    %c0_2 = arith.constant 0 : index
    %3 = vector.load %arg2[%c0, %c0_1, %c0_2] : memref<1x13x256xf32, #tpu.memory_space<vmem>>, vector<1x13x256xf32>
    %4 = vector.shape_cast %3 : vector<1x13x256xf32> to vector<13x256xf32>
    %c0_3 = arith.constant 0 : index
    %c0_4 = arith.constant 0 : index
    %c0_5 = arith.constant 0 : index
    %5 = vector.load %arg3[%c0_3, %c0_4, %c0_5] : memref<1x13x256xf32, #tpu.memory_space<vmem>>, vector<1x13x256xf32>
    %6 = vector.shape_cast %5 : vector<1x13x256xf32> to vector<13x256xf32>
    %7 = tpu.iota {dimensions = array<i32: 0>} : vector<13x1xi32>
    %cst = arith.constant dense<0xFF800000> : vector<256xf32>
    %8 = vector.multi_reduction <maximumf>, %4, %cst [0] : vector<13x256xf32> to vector<256xf32>
    %9 = vector.shape_cast %8 : vector<256xf32> to vector<1x256xf32>
    %10 = vector.broadcast %9 : vector<1x256xf32> to vector<13x256xf32>
    %11 = arith.cmpf oeq, %4, %10 : vector<13x256xf32>
    %c13_i32 = arith.constant 13 : i32
    %12 = vector.shape_cast %7 : vector<13x1xi32> to vector<13x1xi32>
    %13 = vector.broadcast %12 : vector<13x1xi32> to vector<13x256xi32>
    %14 = vector.broadcast %c13_i32 : i32 to vector<13x256xi32>
    %15 = arith.select %11, %13, %14 : vector<13x256xi1>, vector<13x256xi32>
    %cst_6 = arith.constant dense<2147483647> : vector<256xi32>
    %16 = vector.multi_reduction <minsi>, %15, %cst_6 [0] : vector<13x256xi32> to vector<256xi32>
    %17 = vector.shape_cast %16 : vector<256xi32> to vector<1x256xi32>
    %cst_7 = arith.constant dense<0xFF800000> : vector<256xf32>
    %18 = vector.multi_reduction <maximumf>, %6, %cst_7 [0] : vector<13x256xf32> to vector<256xf32>
    %19 = vector.shape_cast %18 : vector<256xf32> to vector<1x256xf32>
    %20 = vector.broadcast %19 : vector<1x256xf32> to vector<13x256xf32>
    %21 = arith.cmpf oeq, %6, %20 : vector<13x256xf32>
    %c13_i32_8 = arith.constant 13 : i32
    %22 = vector.shape_cast %7 : vector<13x1xi32> to vector<13x1xi32>
    %23 = vector.broadcast %22 : vector<13x1xi32> to vector<13x256xi32>
    %24 = vector.broadcast %c13_i32_8 : i32 to vector<13x256xi32>
    %25 = arith.select %21, %23, %24 : vector<13x256xi1>, vector<13x256xi32>
    %cst_9 = arith.constant dense<2147483647> : vector<256xi32>
    %26 = vector.multi_reduction <minsi>, %25, %cst_9 [0] : vector<13x256xi32> to vector<256xi32>
    %27 = vector.shape_cast %26 : vector<256xi32> to vector<1x256xi32>
    %28 = arith.cmpi eq, %17, %27 : vector<1x256xi32>
    %29 = arith.extui %28 : vector<1x256xi1> to vector<1x256xi32>
    %c0_10 = arith.constant 0 : index
    %c0_11 = arith.constant 0 : index
    %30 = vector.load %arg5[%c0_10, %c0_11] : memref<1x256xi32, #tpu.memory_space<vmem>>, vector<1x256xi32>
    %31 = arith.addi %30, %29 : vector<1x256xi32>
    %c0_12 = arith.constant 0 : index
    %c0_13 = arith.constant 0 : index
    %32 = vector.load %arg5[%c0_12, %c0_13] : memref<1x256xi32, #tpu.memory_space<vmem>>, vector<1x256xi32>
    tpu.vector_store %arg5[%c0_12, %c0_13], %31 {strides = array<i32>} : memref<1x256xi32, #tpu.memory_space<vmem>>, vector<1x256xi32>,
    %c0_i32_14 = arith.constant 0 : i32
    %33 = arith.cmpi eq, %arg1, %c0_i32_14 : i32
    %34 = arith.extui %33 : i1 to i32
    %c0_i32_15 = arith.constant 0 : i32
    %35 = arith.cmpi ne, %34, %c0_i32_15 : i32
    scf.if %35 {
      %c0_16 = arith.constant 0 : index
      %c0_17 = arith.constant 0 : index
      %36 = vector.load %arg5[%c0_16, %c0_17] : memref<1x256xi32, #tpu.memory_space<vmem>>, vector<1x256xi32>
      %37 = vector.shape_cast %36 : vector<1x256xi32> to vector<1x1x256xi32>
      %cst_18 = arith.constant dense<0> : vector<1xi32>
      %38 = vector.multi_reduction <add>, %37, %cst_18 [1, 2] : vector<1x1x256xi32> to vector<1xi32>
      %39 = vector.shape_cast %38 : vector<1xi32> to vector<1x1x1xi32>
      %40 = vector.extract %39[0, 0, 0] : i32 from vector<1x1x1xi32>
      %41 = vector.broadcast %40 : i32 to vector<1x1x128xi32>
      %c0_19 = arith.constant 0 : index
      %c0_20 = arith.constant 0 : index
      %c0_21 = arith.constant 0 : index
      %42 = vector.load %arg4[%c0_19, %c0_20, %c0_21] : memref<1x1x128xi32, #tpu.memory_space<vmem>>, vector<1x1x128xi32>
      tpu.vector_store %arg4[%c0_19, %c0_20, %c0_21], %41 {strides = array<i32>} : memref<1x1x128xi32, #tpu.memory_space<vmem>>, vector<1x1x128xi32>,
    } else {
    }
    return
  }
  func.func @transform_0(%arg0: i32, %arg1: i32) -> (i32, i32, i32) {
    %c0_i32 = arith.constant 0 : i32
    %c0_i32_0 = arith.constant 0 : i32
    return %arg0, %c0_i32, %arg1 : i32, i32, i32
  }
  func.func @transform_1(%arg0: i32, %arg1: i32) -> (i32, i32, i32) {
    %c0_i32 = arith.constant 0 : i32
    %c0_i32_0 = arith.constant 0 : i32
    return %arg0, %c0_i32, %arg1 : i32, i32, i32
  }
  func.func @transform_2(%arg0: i32, %arg1: i32) -> (i32, i32, i32) {
    %c0_i32 = arith.constant 0 : i32
    %c0_i32_0 = arith.constant 0 : i32
    %c0_i32_1 = arith.constant 0 : i32
    return %arg0, %c0_i32, %c0_i32_0 : i32, i32, i32
  }
}

</mosaic_0001>

<bundles_post_ra>
// kernel: tpu_custom_call.1
= control target key start
LH: loop header
LB: loop body
LE: loop exit
PB: predicated region body
PF: predicated region fallthrough
CT: control target
= control target key end

     0   :  { %7 = vsyncpa [#allocation4], 0  ;;  %s752_s0 = inlined_call_operand.vmem [shape: f32[2,13,256], index: 0, kind: input, shape index: {}]   ;;  %s753_s1 = inlined_call_operand.vmem [shape: f32[2,13,256], index: 1, kind: input, shape index: {}]   ;;  %s754_s2 = inlined_call_operand.hbm [shape: s32[2,1,128], index: 2, kind: output, shape index: {}]  }
   0x1   :  { %9 = vsyncpa [#allocation4 + $0x1], 0  ;;  %s633_s9 = smov 0   ;;  %s635_s10 = smov 0  }
   0x2   :  { %s637_s11 = smov 0   ;;  %s639_s12 = smov 0  }
   0x3   :  { %s641_s13 = smov 0   ;;  %s643_s14 = smov 0  }
   0x4 LB: > { %s466_s15 = sadd.s32 4294967295, %s615_s14   ;;  %s467_s16 = sadd.s32 4294967294, %s615_s14   ;;  %s615_s14 = sphi %s643_s14, %s15_s14   ;;  %s611_s13 = sphi %s641_s13, %s763_s13   ;;  %s607_s12 = sphi %s639_s12, %s762_s12   ;;  %s603_s11 = sphi %s637_s11, %s761_s11   ;;  %s599_s10 = sphi %s635_s10, %s760_s10   ;;  %s595_s9 = sphi %s633_s9, %s759_s9  }
   0x5   : > { %s27_s17 = sadd.s32 1, %s611_s13  ;;  %s90_s18 = sadd.s32 1, %s603_s11 }
   0x6   : > { %p29_p0 = scmp.ge.s32.totalorder %s27_s17, 2  ;;  %p100_p1 = scmp.ne.s32.totalorder %s603_s11, %s599_s10 }
   0x7   : > { %p101_p2 = scmp.eq.s32.totalorder %s466_s15, 1  ;;  %p106_p3 = scmp.ne.s32.totalorder %s599_s10, %s595_s9 }
   0x8   : > { %s765_s17 = smov (%p29_p0, %s27_s17), 0  ;;  %p107_p5 = scmp.eq.s32.totalorder %s467_s16, 1 }
   0x9   : > { %p673_p4 = por %p101_p2, %p100_p1  ;;  %s87_s20 = ssub.s32 %s611_s13, %s765_s17 }
   0xa   : > { %p470_p6 = scmp.ge.s32.totalorder %s615_s14, 1  ;;  %p88_p7 = scmp.eq.s32.totalorder %s87_s20, 0 }
   0xb   : > { %p680_p8 = por %p107_p5, %p106_p3  ;;  %p151_p9 = scmp.lt.s32.totalorder %s615_s14, 3 }
   0xc   : > { %s686_s22 = scalar_select %p88_p7, %s603_s11, %s90_s18  }
   0xd   : > { %p152_p10 = pnand %p470_p6, %p151_p9 }
   0xe   : > { %p186_p11 = scmp.lt.s32.totalorder (!%p152_p10), %s607_s12, 1  ;;  %s183_s3 = sand.u32 (!%p152_p10), 1, %s599_s10  }
   0xf   : > { %155 = sbr.rel (%p152_p10) target bundleno = 280 (0x118), region = 28  ;;  %s375_s6 = scalar_lea.hbm (!%p152_p10), %s754_s2, %s607_s12 }
  0x10   : > { %s184_s7 = scalar_lea.vmem (!%p152_p10), [#allocation3], %s183_s3  ;;  %s379_s15 = sshll.u32 (!%p152_p10), %s375_s6, 4  ;;  %s380_s15 = int_to_ptr.hbm [resolvable:$true] %s379_s15 }
  0x11   : > { %s377_s8 = sshll.u32 (!%p152_p10), %s184_s7, 4  ;;  %s367_s18 = scalar_lea.sflag (!%p152_p10), [#allocation4], %s183_s3  ;;  %s378_s8 = int_to_ptr.vmem [resolvable:$true] %s377_s8 }
  0x12   : > { %s551_s20 = sshra.s32 (!%p152_p10), %s380_s15, 4  ;;  %s552_s20 = int_to_ptr.hbm [resolvable:$true] %s551_s20 }
  0x13   : > { %p558_p1 = scmp.lt.s32.totalorder (!%p152_p10), %s552_s20, %s754_s2 }
  0x14   : > { %v209_v0 = vlaneseq  ;;  %s187_s23 = scalar_select %p186_p11, %s607_s12, 1  ;;  %v617_v2 = vmov 0   ;;  %vm225_vm1 = vcmask 1044480  }
  0x15   : > { %s557_s12 = scalar_lea.hbm %s754_s2, 2 }
  0x16   : > { %vm690_vm0 = vcmp.lt.s32.totalorder %v209_v0, 256  ;;  %s477_s24 = sshll.u32 %s187_s23, 5  ;;  %v223_v29 = vshrl.u32 %v209_v0, 7  ;;  %s553_s23 = scalar_lea.hbm %s552_s20, 1 }
  0x17   : > { %213 = vst.msk [vmem:[#allocation2] sm:$0x3] %vm690_vm0, %v617_v2  ;;  %s193_s27 = scalar_lea.vmem %s752_s0, %s477_s24  ;;  %s203_s30 = scalar_lea.vmem %s753_s1, %s477_s24 }
  0x18   : > { %v214_v3 = vld [vmem:[%s193_s27] sm:$0xff]  ;;  %v215_v4 = vld [vmem:[%s193_s27 + $0x8] sm:$0xff]  ;;  %v216_v5 = vld [vmem:[%s193_s27 + $0x10] sm:$0x1f]  ;;  %v224_v38 = vadd.s32 8, %v223_v29  ;;  %p554_p12 = scmp.ne.s32.totalorder %s552_s20, %s553_s23  ;;  %p559_p2 = scmp.lt.s32.totalorder %s557_s12, %s553_s23 }
  0x19   : > { %v217_v6 = vld [vmem:[%s193_s27 + $0x18] sm:$0x1f]  ;;  %v218_v7 = vld [vmem:[%s203_s30] sm:$0xff]  ;;  %v219_v8 = vld [vmem:[%s203_s30 + $0x8] sm:$0xff]  ;;  %v226_v9 = vsel %vm225_vm1, %v216_v5, -inf }
  0x1a   : > { %v220_v10 = vld [vmem:[%s203_s30 + $0x10] sm:$0x1f]  ;;  %v221_v11 = vld [vmem:[%s203_s30 + $0x18] sm:$0x1f]  ;;  %v227_v12 = vmax.f32 %v214_v3, %v226_v9  ;;  %v234_v13 = vsel %vm225_vm1, %v217_v6, -inf  ;;  %p555_p13 = pnand %p554_p12, %p673_p4  ;;  %p560_p3 = por %p559_p2, %p558_p1 }
  0x1b   : > { %v235_v14 = vmax.f32 %v215_v4, %v234_v13  ;;  %v274_v15 = vsel %vm225_vm1, %v220_v10, -inf  ;;  %v282_v16 = vsel %vm225_vm1, %v221_v11, -inf }
  0x1c   : > { %v228_v17 = vrot.slane %v227_v12, 4  ;;  %v275_v18 = vmax.f32 %v218_v7, %v274_v15  ;;  %v283_v19 = vmax.f32 %v219_v8, %v282_v16  ;;  %p556_p0 = pneg %p555_p13 }
  0x1d   : > { %v236_v20 = vrot.slane %v235_v14, 4 }
  0x1e   : > { %v229_v21 = vmax.f32 %v227_v12, %v228_v17  ;;  %v276_v22 = vrot.slane %v275_v18, 4  ;;  %v284_v23 = vrot.slane %v283_v19, 4  ;;  %p561_p5 = pnand %p560_p3, %p556_p0 }
  0x1f   : > { %v237_v24 = vmax.f32 %v235_v14, %v236_v20 }
  0x20   : > { %v230_v25 = vrot.slane %v229_v21, 2  ;;  %v277_v26 = vmax.f32 %v275_v18, %v276_v22  ;;  %v285_v27 = vmax.f32 %v283_v19, %v284_v23 }
  0x21   : > { %v238_v28 = vrot.slane %v237_v24, 2 }
  0x22   : > { %v231_v30 = vmax.f32 %v229_v21, %v230_v25  ;;  %v278_v31 = vrot.slane %v277_v26, 2  ;;  %v286_v32 = vrot.slane %v285_v27, 2  ;;  %v326_v25 = vld [vmem:[#allocation2] sm:$0x3] }
  0x23   : > { %v239_v33 = vmax.f32 %v237_v24, %v238_v28 }
  0x24   : > { %v232_v34 = vrot.slane %v231_v30, 1  ;;  %v279_v35 = vmax.f32 %v277_v26, %v278_v31  ;;  %v287_v36 = vmax.f32 %v285_v27, %v286_v32 }
  0x25   : > { %v240_v37 = vrot.slane %v239_v33, 1 }
  0x26   : > { %v233_v39 = vmax.f32 %v231_v30, %v232_v34  ;;  %v280_v40 = vrot.slane %v279_v35, 1  ;;  %v288_v41 = vrot.slane %v287_v36, 1 }
  0x27   : > { %v241_v42 = vmax.f32 %v239_v33, %v240_v37 }
  0x28   : > { %vm242_vm2 = vcmp.eq.f32.partialorder %v214_v3, %v233_v39  ;;  %vm244_vm3 = vcmp.eq.f32.partialorder %v216_v5, %v233_v39  ;;  %v281_v43 = vmax.f32 %v279_v35, %v280_v40  ;;  %v289_v44 = vmax.f32 %v287_v36, %v288_v41 }
  0x29   : > { %vm243_vm4 = vcmp.eq.f32.partialorder %v215_v4, %v241_v42  ;;  %vm245_vm5 = vcmp.eq.f32.partialorder %v217_v6, %v241_v42  ;;  %v246_v45 = vsel %vm242_vm2, %v223_v29, 13  ;;  %v248_v46 = vsel %vm244_vm3, %v224_v38, 13 }
  0x2a   : > { %v247_v47 = vsel %vm243_vm4, %v223_v29, 13  ;;  %v249_v48 = vsel %vm245_vm5, %v224_v38, 13  ;;  %v250_v49 = vsel %vm225_vm1, %v248_v46, 2147483647  ;;  %vm290_vm6 = vcmp.eq.f32.partialorder %v218_v7, %v281_v43 }
  0x2b   : > { %vm251_vm7 = vcmp.lt.s32.totalorder %v246_v45, %v250_v49  ;;  %v262_v50 = vsel %vm225_vm1, %v249_v48, 2147483647  ;;  %vm291_vm8 = vcmp.eq.f32.partialorder %v219_v8, %v289_v44  ;;  %vm292_vm9 = vcmp.eq.f32.partialorder %v220_v10, %v281_v43 }
  0x2c   : > { %v252_v51 = vsel %vm251_vm7, %v246_v45, %v250_v49  ;;  %vm263_vm10 = vcmp.lt.s32.totalorder %v247_v47, %v262_v50  ;;  %vm293_vm11 = vcmp.eq.f32.partialorder %v221_v11, %v289_v44  ;;  %v294_v52 = vsel %vm290_vm6, %v223_v29, 13 }
  0x2d   : > { %v253_v53 = vrot.slane %v252_v51, 4  ;;  %v264_v54 = vsel %vm263_vm10, %v247_v47, %v262_v50  ;;  %v295_v55 = vsel %vm291_vm8, %v223_v29, 13  ;;  %v296_v56 = vsel %vm292_vm9, %v224_v38, 13 }
  0x2e   : > { %v265_v57 = vrot.slane %v264_v54, 4  ;;  %v297_v58 = vsel %vm293_vm11, %v224_v38, 13  ;;  %v298_v59 = vsel %vm225_vm1, %v296_v56, 2147483647 }
  0x2f   : > { %vm254_vm12 = vcmp.lt.s32.totalorder %v252_v51, %v253_v53  ;;  %vm299_vm13 = vcmp.lt.s32.totalorder %v294_v52, %v298_v59  ;;  %v310_v60 = vsel %vm225_vm1, %v297_v58, 2147483647 }
  0x30   : > { %v255_v61 = vsel %vm254_vm12, %v252_v51, %v253_v53  ;;  %vm266_vm14 = vcmp.lt.s32.totalorder %v264_v54, %v265_v57  ;;  %v300_v62 = vsel %vm299_vm13, %v294_v52, %v298_v59  ;;  %vm311_vm15 = vcmp.lt.s32.totalorder %v295_v55, %v310_v60 }
  0x31   : > { %v256_v63 = vrot.slane %v255_v61, 2  ;;  %v267_v0 = vsel %vm266_vm14, %v264_v54, %v265_v57  ;;  %v301_v3 = vrot.slane %v300_v62, 4  ;;  %v312_v4 = vsel %vm311_vm15, %v295_v55, %v310_v60 }
  0x32   : > { %v268_v5 = vrot.slane %v267_v0, 2  ;;  %v313_v6 = vrot.slane %v312_v4, 4  ;;  %vm328_vm13 = vcmask 1040384  }
  0x33   : > { %vm257_vm2 = vcmp.lt.s32.totalorder %v255_v61, %v256_v63  ;;  %vm302_vm3 = vcmp.lt.s32.totalorder %v300_v62, %v301_v3 }
  0x34   : > { %v258_v7 = vsel %vm257_vm2, %v255_v61, %v256_v63  ;;  %vm269_vm4 = vcmp.lt.s32.totalorder %v267_v0, %v268_v5  ;;  %v303_v8 = vsel %vm302_vm3, %v300_v62, %v301_v3  ;;  %vm314_vm5 = vcmp.lt.s32.totalorder %v312_v4, %v313_v6 }
  0x35   : > { %v259_v9 = vrot.slane %v258_v7, 1  ;;  %v270_v10 = vsel %vm269_vm4, %v267_v0, %v268_v5  ;;  %v304_v11 = vrot.slane %v303_v8, 2  ;;  %v315_v12 = vsel %vm314_vm5, %v312_v4, %v313_v6 }
  0x36   : > { %v271_v13 = vrot.slane %v270_v10, 1  ;;  %v316_v14 = vrot.slane %v315_v12, 2 }
  0x37   : > { %vm260_vm1 = vcmp.lt.s32.totalorder %v258_v7, %v259_v9  ;;  %vm305_vm6 = vcmp.lt.s32.totalorder %v303_v8, %v304_v11 }
  0x38   : > { %vm272_vm7 = vcmp.lt.s32.totalorder %v270_v10, %v271_v13  ;;  %v306_v15 = vsel %vm305_vm6, %v303_v8, %v304_v11  ;;  %vm317_vm8 = vcmp.lt.s32.totalorder %v315_v12, %v316_v14  ;;  %v261_v18 = vsel %vm260_vm1, %v258_v7, %v259_v9 }
  0x39   : > { %v307_v16 = vrot.slane %v306_v15, 1  ;;  %v318_v17 = vsel %vm317_vm8, %v315_v12, %v316_v14  ;;  %v273_v20 = vsel %vm272_vm7, %v270_v10, %v271_v13 }
  0x3a   : > { %v319_v19 = vrot.slane %v318_v17, 1 }
  0x3b   : > { %vm308_vm9 = vcmp.lt.s32.totalorder %v306_v15, %v307_v16 }
  0x3c   : > { %v309_v21 = vsel %vm308_vm9, %v306_v15, %v307_v16  ;;  %vm320_vm10 = vcmp.lt.s32.totalorder %v318_v17, %v319_v19 }
  0x3d   : > { %v321_v22 = vsel %vm320_vm10, %v318_v17, %v319_v19  ;;  %vm322_vm11 = vcmp.eq.s32.totalorder %v261_v18, %v309_v21 }
  0x3e   : > { %vm323_vm12 = vcmp.eq.s32.totalorder %v273_v20, %v321_v22  ;;  %v324_v23 = vsel %vm322_vm11, 1, %v617_v2 }
  0x3f   : > { %v325_v24 = vsel %vm323_vm12, 1, %v617_v2 }
  0x40   : > { %v327_v26 = vrot.slane %v325_v24, 7 }
  0x42   : > { %v329_v27 = vsel %vm328_vm13, %v324_v23, %v327_v26 }
  0x43   : > { %v330_v28 = vadd.s32 %v329_v27, %v326_v25 }
  0x45   : > { %335 = vst.msk [vmem:[#allocation2] sm:$0x3] %vm690_vm0, %v330_v28 }
  0x4c   : > { %v339_v29 = vld [vmem:[#allocation2] sm:$0x3] }
  0x4d   : > { %v340_v30 = vperm.slane %v339_v29, 0  ;;  %v341_v31 = vperm.slane %v339_v29, 1 }
  0x4f   : > { %v342_v32 = vsel %vm328_vm13, %v340_v30, 0  ;;  %v343_v33 = vsel %vm328_vm13, %v341_v31, 0 }
  0x50   : > { %v344_v34 = vadd.s32 %v343_v33, %v342_v32 }
  0x52   : > { %v346_v35 = vshrl.u32 %v344_v34, 16  ;;  %v345_v37 = vand.u32 65535, %v344_v34 }
  0x54   : > { %v348_v36 = vcvt.s32.f32 %v346_v35  ;;  %v347_v2 = vcvt.s32.f32 %v345_v37 }
  0x56   : > { %351 = vadd.xlane.f32.xlu0 %v348_v36 }
  0x5e   : > { %349 = vadd.xlane.f32.xlu0 %v347_v2 }
  0xc9   : > { %v352_v38 = vpop.xlane.xlu0 %351 }
  0xca   : > { %v354_v39 = vcvt.f32.s32 %v352_v38 }
  0xcc   : > { %v355_v41 = vshll.u32 %v354_v39, 16 }
  0xd1   : > { %v350_v40 = vpop.xlane.xlu0 %349 }
  0xd2   : > { %v353_v1 = vcvt.f32.s32 %v350_v40 }
  0xd4   : > { %v356_v42 = vadd.s32 %v355_v41, %v353_v1 }
  0xd6   : > { %v357_v43 = vrot.slane %v356_v42, 4 }
  0xd8   : > { %v358_v44 = vadd.s32 %v357_v43, %v356_v42 }
  0xda   : > { %v359_v45 = vrot.slane %v358_v44, 2 }
  0xdc   : > { %v360_v46 = vadd.s32 %v359_v45, %v358_v44 }
  0xde   : > { %v361_v47 = vrot.slane %v360_v46, 1 }
  0xe0   : > { %v362_v48 = vadd.s32 %v361_v47, %v360_v46 }
  0xe2   : > { %479 = vpush %v362_v48 }
 0x113   : > { %s480_s16 = spop %479 }
 0x114   : > { %v364_v49 = vstv %s480_s16 }
 0x115   : > { %365 = vst [vmem:[%s184_s7] sm:$0x1] %v364_v49 }
 0x116   : > { %564 = shalt.err (!%p561_p5)
}
 0x117   : > { %481 = dma.vmem_to_hbm [thread:$0]  (%p673_p4), %s378_s8, 16, %s380_s15, %s367_s18  }
 0x118 PF: > { %p487_p6 = scmp.ge.s32.totalorder %s615_s14, 2  ;;  %s391_s28 = sand.u32 1, %s595_s9  }
 0x119   : > { %s392_s29 = scalar_lea.sflag [#allocation4], %s391_s28 }
 0x11a   : > { %p484_p7 = pnand %p487_p6, %p680_p8 }
 0x11c   : > { %p485_p9 = pneg %p484_p7 }
 0x11e   : > { %590 = dma.done.wait (%p485_p9), %s392_s29, 16  }
 0x11f   : > { %592 = vsyncadd (%p485_p9), %s392_s29, 4294967280  ;;  %s15_s14 = sadd.s32 1, %s615_s14   ;;  %s759_s9 = smov %s599_s10 }
 0x120   : > { %p12_p10 = scmp.ge.s32.totalorder %s15_s14, 4   ;;  %s760_s10 = smov %s603_s11 }
 0x121   : > { %s761_s11 = smov %s686_s22  ;;  %s762_s12 = smov %s611_s13 }
 0x122   : > { %s763_s13 = smov %s765_s17  ;;  %14 = sbr.rel (!%p12_p10) target bundleno = 4 (0x4), region = 74 }
 0x127   :  { %397 = vsyncpa [#allocation4], 1 }
 0x128   :  { %399 = vsyncpa [#allocation4 + $0x1], 1 }

</bundles_post_ra>
